<compile_context>
chip_gen: v7x
topology: tpu7x:2x2x1
jax: 0.10.0
libtpu: 0.0.40
codegen_flags: <defaults>
</compile_context>

<pallas_src>
import functools

import jax
import jax.numpy as jnp
import numpy as np
from jax import lax
from jax.experimental import pallas as pl
from jax.experimental.pallas import tpu as pltpu


def _dws_kernel(x_ref, wdw_ref, bdw_ref, wpw_ref, bpw_ref, o_ref,
                *, K, W, OH, OW, C, Cout, NB):
    """One fused batch-block per grid step, batch*channels on sublanes.

    x_ref  : (NB*C, H*W)      input, spatial flattened onto the lane axis
    wdw_ref: (K*K, NB*C, 1)   depthwise weights, BN1 scale folded, batch-tiled
    bdw_ref: (NB*C, 1)        folded BN1 shift (includes depthwise bias), tiled
    wpw_ref: (C, Cout, 1)     pointwise weights, BN2 scale folded
    bpw_ref: (Cout, 1)        folded BN2 shift
    o_ref  : (NB*Cout, L)     padded output, L = (OH-1)*W + OW (row stride W)
    """
    L = (OH - 1) * W + OW
    R = NB * C

    # Hoisted loads — the whole working set is a handful of vregs.
    x = x_ref[...].astype(jnp.float32)          # (NB*C, H*W)
    wdw = wdw_ref[...].astype(jnp.float32)      # (K*K, NB*C, 1)
    bdw = bdw_ref[...].astype(jnp.float32)      # (NB*C, 1)
    wpw = wpw_ref[...].astype(jnp.float32)      # (C, Cout, 1)
    bpw = bpw_ref[...].astype(jnp.float32)      # (Cout, 1)

    # ---- depthwise conv (valid, stride 1) + folded BN1 + ReLU ----
    # acc[r, j] = shift[r] + sum_{kh,kw} w[t, r] * x[r, j + kh*W + kw]
    # Lanes j = oh*W + ow with ow >= OW hold wrapped garbage; they are dropped
    # by the wrapper-side compaction.  Max slice end = (K-1)*(W+1) + L = H*W.
    acc = jnp.broadcast_to(bdw, (R, L))
    for kh in range(K):
        for kw in range(K):
            s = kh * W + kw
            acc = acc + x[:, s:s + L] * wdw[kh * K + kw]
    dw = jnp.maximum(acc, 0.0)                  # (NB*C, L)

    # ---- pointwise 1x1 conv + folded BN2 + ReLU (VPU broadcast-FMAs) ----
    bpw_b = jnp.broadcast_to(bpw, (Cout, L))    # hoisted out of the loops
    for n in range(NB):
        pw = bpw_b
        for c in range(C):
            pw = pw + wpw[c] * dw[n * C + c:n * C + c + 1, :]
        # Full lane-width store at an 8-aligned sublane offset (lane-dense).
        o_ref[n * Cout:(n + 1) * Cout, :] = jnp.maximum(pw, 0.0).astype(o_ref.dtype)


@functools.partial(jax.jit, static_argnames=("kernel_size",))
def dws_conv(x_nchw, w_dw_folded, shift_dw, w_pw_folded, shift_pw, *, kernel_size):
    """x_nchw: (N, C, H, W).  w_dw_folded: (C, K*K) BN1-scale-folded.
    w_pw_folded: (Cout, C) BN2-scale-folded.  shift_dw: (C,), shift_pw: (Cout,).
    Returns (N, Cout, OH, OW)."""
    N, C, H, W = x_nchw.shape
    K = kernel_size
    OH, OW = H - K + 1, W - K + 1
    Cout = w_pw_folded.shape[0]
    L = (OH - 1) * W + OW          # valid flat span (row stride W)

    # All batch elements in one grid step (optimal for single-TC v5e/v6e).
    NB = N
    # TODO(synk): on v7x use NB = cdiv(N, 2) so both TensorCores get a step.

    # Free (metadata-only) reshape: batch*channels on rows, spatial on lanes.
    x_rows = x_nchw.reshape(N * C, H * W)

    # Tiny host/XLA-side weight prep: sublane-aligned, batch-tiled layouts.
    wdw_taps = jnp.tile(w_dw_folded.T, (1, NB))[..., None]        # (K*K, NB*C, 1)
    bdw_rows = jnp.tile(shift_dw.reshape(-1), NB)[:, None]        # (NB*C, 1)
    wpw_cols = w_pw_folded.T[..., None]                           # (C, Cout, 1)
    bpw_rows = shift_pw.reshape(Cout, 1)                          # (Cout, 1)

    kernel = functools.partial(_dws_kernel, K=K, W=W, OH=OH, OW=OW,
                               C=C, Cout=Cout, NB=NB)

    out_flat = pl.pallas_call(
        kernel,
        out_shape=jax.ShapeDtypeStruct((N * Cout, L), x_nchw.dtype),
        grid_spec=pltpu.PrefetchScalarGridSpec(
            num_scalar_prefetch=0,
            grid=(pl.cdiv(N, NB),),
            in_specs=[
                pl.BlockSpec((NB * C, H * W), lambda i: (i, 0)),
                pl.BlockSpec((K * K, NB * C, 1), lambda i: (0, 0, 0)),
                pl.BlockSpec((NB * C, 1), lambda i: (0, 0)),
                pl.BlockSpec((C, Cout, 1), lambda i: (0, 0, 0)),
                pl.BlockSpec((Cout, 1), lambda i: (0, 0)),
            ],
            out_specs=pl.BlockSpec((NB * Cout, L), lambda i: (i, 0)),
        ),
        compiler_params=pltpu.CompilerParams(
            dimension_semantics=("parallel",)),
    )(x_rows, wdw_taps, bdw_rows, wpw_cols, bpw_rows)

    # Wrapper-side compaction (single fused XLA copy): pad the row-stride-W
    # layout to (OH, W) and drop the K-1 wrapped columns per row.
    out = out_flat.reshape(N, Cout, L)
    out = jnp.pad(out, ((0, 0), (0, 0), (0, OH * W - L)))
    out = out.reshape(N, Cout, OH, W)[..., :OW]
    return out


def reference_dws_conv(x, w_dw_oihw, b_dw, bn1, w_pw_oihw, bn2, eps=1e-5):
    """Pure-JAX reference using lax.conv_general_dilated (NCHW)."""
    C = x.shape[1]
    g1, be1, m1, v1 = bn1
    g2, be2, m2, v2 = bn2

    y = lax.conv_general_dilated(
        x, w_dw_oihw, window_strides=(1, 1), padding="VALID",
        feature_group_count=C, dimension_numbers=("NCHW", "OIHW", "NCHW"))
    y = y + b_dw[None, :, None, None]
    y = (y - m1[None, :, None, None]) / jnp.sqrt(v1 + eps)[None, :, None, None]
    y = y * g1[None, :, None, None] + be1[None, :, None, None]
    y = jnp.maximum(y, 0.0)

    z = lax.conv_general_dilated(
        y, w_pw_oihw, window_strides=(1, 1), padding="VALID",
        dimension_numbers=("NCHW", "OIHW", "NCHW"))
    z = (z - m2[None, :, None, None]) / jnp.sqrt(v2 + eps)[None, :, None, None]
    z = z * g2[None, :, None, None] + be2[None, :, None, None]
    z = jnp.maximum(z, 0.0)
    return z


if __name__ == "__main__":
    # Small shapes consistent with DWSConv(in_channels=4, out_channels=8, kernel_size=3)
    N, C, H, W = 2, 4, 16, 16
    Cout, K = 8, 3
    eps = 1e-5

    key = jax.random.PRNGKey(0)
    ks = jax.random.split(key, 12)

    x = jax.random.normal(ks[0], (N, C, H, W), jnp.float32)

    # Parameters (deterministic, PyTorch layout), then folded for the kernel.
    w_dw_oihw = jax.random.normal(ks[1], (C, 1, K, K), jnp.float32) * 0.2
    b_dw = jax.random.normal(ks[2], (C,), jnp.float32) * 0.1
    gamma1 = 1.0 + 0.1 * jax.random.normal(ks[3], (C,), jnp.float32)
    beta1 = 0.1 * jax.random.normal(ks[4], (C,), jnp.float32)
    mean1 = 0.1 * jax.random.normal(ks[5], (C,), jnp.float32)
    var1 = 0.5 + jnp.abs(jax.random.normal(ks[6], (C,), jnp.float32))

    w_pw_oihw = jax.random.normal(ks[7], (Cout, C, 1, 1), jnp.float32) * 0.2
    gamma2 = 1.0 + 0.1 * jax.random.normal(ks[8], (Cout,), jnp.float32)
    beta2 = 0.1 * jax.random.normal(ks[9], (Cout,), jnp.float32)
    mean2 = 0.1 * jax.random.normal(ks[10], (Cout,), jnp.float32)
    var2 = 0.5 + jnp.abs(jax.random.normal(ks[11], (Cout,), jnp.float32))

    # Fold conv bias + BatchNorm scales directly into the weights (host side).
    scale_dw = gamma1 / jnp.sqrt(var1 + eps)                       # (C,)
    shift_dw = (b_dw - mean1) * scale_dw + beta1                   # (C,)
    scale_pw = gamma2 / jnp.sqrt(var2 + eps)                       # (Cout,)
    shift_pw = beta2 - mean2 * scale_pw                            # (Cout,)

    w_dw_folded = (w_dw_oihw[:, 0] * scale_dw[:, None, None]).reshape(C, K * K)
    w_pw_folded = w_pw_oihw[:, :, 0, 0] * scale_pw[:, None]        # (Cout, C)

    out = dws_conv(x, w_dw_folded, shift_dw, w_pw_folded, shift_pw,
                   kernel_size=K)
    out = jax.block_until_ready(out)

    ref = reference_dws_conv(
        x, w_dw_oihw, b_dw, (gamma1, beta1, mean1, var1),
        w_pw_oihw, (gamma2, beta2, mean2, var2), eps=eps)
    ref = jax.block_until_ready(ref)

    np.testing.assert_allclose(np.asarray(out), np.asarray(ref),
                               rtol=1e-4, atol=1e-4)
    assert out.shape == (N, Cout, H - K + 1, W - K + 1)
    print("KERNEL_OK")
</pallas_src>

<mosaic_0001>
module attributes {stable_mosaic.version = 11 : i64} {
  func.func @_dws_kernel(%arg0: i32, %arg1: memref<8x256xf32, #tpu.memory_space<vmem>>, %arg2: memref<9x8x1xf32, #tpu.memory_space<vmem>>, %arg3: memref<8x1xf32, #tpu.memory_space<vmem>>, %arg4: memref<4x8x1xf32, #tpu.memory_space<vmem>>, %arg5: memref<8x1xf32, #tpu.memory_space<vmem>>, %arg6: memref<16x222xf32, #tpu.memory_space<vmem>>) attributes {dimension_semantics = [#tpu.dimension_semantics<parallel>], iteration_bounds = array<i64: 1>, scalar_prefetch = 0 : i64, scratch_operands = 0 : i64, tpu.core_type = #tpu.core_type<tc>, window_params = [{transform_indices = @transform_0, window_bounds = array<i64: 8, 256>}, {pipeline_mode = #tpu.pipeline_mode<synchronous>, transform_indices = @transform_1, window_bounds = array<i64: 9, 8, 1>}, {pipeline_mode = #tpu.pipeline_mode<synchronous>, transform_indices = @transform_2, window_bounds = array<i64: 8, 1>}, {pipeline_mode = #tpu.pipeline_mode<synchronous>, transform_indices = @transform_3, window_bounds = array<i64: 4, 8, 1>}, {pipeline_mode = #tpu.pipeline_mode<synchronous>, transform_indices = @transform_4, window_bounds = array<i64: 8, 1>}, {transform_indices = @transform_5, window_bounds = array<i64: 16, 222>}]} {
    %c0 = arith.constant 0 : index
    %c0_0 = arith.constant 0 : index
    %0 = vector.load %arg1[%c0, %c0_0] : memref<8x256xf32, #tpu.memory_space<vmem>>, vector<8x256xf32>
    %c0_1 = arith.constant 0 : index
    %c0_2 = arith.constant 0 : index
    %c0_3 = arith.constant 0 : index
    %1 = vector.load %arg2[%c0_1, %c0_2, %c0_3] : memref<9x8x1xf32, #tpu.memory_space<vmem>>, vector<9x8x1xf32>
    %c0_4 = arith.constant 0 : index
    %c0_5 = arith.constant 0 : index
    %2 = vector.load %arg3[%c0_4, %c0_5] : memref<8x1xf32, #tpu.memory_space<vmem>>, vector<8x1xf32>
    %c0_6 = arith.constant 0 : index
    %c0_7 = arith.constant 0 : index
    %c0_8 = arith.constant 0 : index
    %3 = vector.load %arg4[%c0_6, %c0_7, %c0_8] : memref<4x8x1xf32, #tpu.memory_space<vmem>>, vector<4x8x1xf32>
    %c0_9 = arith.constant 0 : index
    %c0_10 = arith.constant 0 : index
    %4 = vector.load %arg5[%c0_9, %c0_10] : memref<8x1xf32, #tpu.memory_space<vmem>>, vector<8x1xf32>
    %5 = vector.shape_cast %2 : vector<8x1xf32> to vector<8x1xf32>
    %6 = vector.broadcast %5 : vector<8x1xf32> to vector<8x222xf32>
    %7 = vector.extract_strided_slice %0 {offsets = [0, 0], sizes = [8, 222], strides = [1, 1]} : vector<8x256xf32> to vector<8x222xf32>
    %8 = vector.extract_strided_slice %1 {offsets = [0, 0, 0], sizes = [1, 8, 1], strides = [1, 1, 1]} : vector<9x8x1xf32> to vector<1x8x1xf32>
    %9 = vector.shape_cast %8 : vector<1x8x1xf32> to vector<8x1xf32>
    %10 = vector.broadcast %9 : vector<8x1xf32> to vector<8x222xf32>
    %11 = arith.mulf %7, %10 : vector<8x222xf32>
    %12 = arith.addf %6, %11 : vector<8x222xf32>
    %13 = vector.extract_strided_slice %0 {offsets = [0, 1], sizes = [8, 222], strides = [1, 1]} : vector<8x256xf32> to vector<8x222xf32>
    %14 = vector.extract_strided_slice %1 {offsets = [1, 0, 0], sizes = [1, 8, 1], strides = [1, 1, 1]} : vector<9x8x1xf32> to vector<1x8x1xf32>
    %15 = vector.shape_cast %14 : vector<1x8x1xf32> to vector<8x1xf32>
    %16 = vector.broadcast %15 : vector<8x1xf32> to vector<8x222xf32>
    %17 = arith.mulf %13, %16 : vector<8x222xf32>
    %18 = arith.addf %12, %17 : vector<8x222xf32>
    %19 = vector.extract_strided_slice %0 {offsets = [0, 2], sizes = [8, 222], strides = [1, 1]} : vector<8x256xf32> to vector<8x222xf32>
    %20 = vector.extract_strided_slice %1 {offsets = [2, 0, 0], sizes = [1, 8, 1], strides = [1, 1, 1]} : vector<9x8x1xf32> to vector<1x8x1xf32>
    %21 = vector.shape_cast %20 : vector<1x8x1xf32> to vector<8x1xf32>
    %22 = vector.broadcast %21 : vector<8x1xf32> to vector<8x222xf32>
    %23 = arith.mulf %19, %22 : vector<8x222xf32>
    %24 = arith.addf %18, %23 : vector<8x222xf32>
    %25 = vector.extract_strided_slice %0 {offsets = [0, 16], sizes = [8, 222], strides = [1, 1]} : vector<8x256xf32> to vector<8x222xf32>
    %26 = vector.extract_strided_slice %1 {offsets = [3, 0, 0], sizes = [1, 8, 1], strides = [1, 1, 1]} : vector<9x8x1xf32> to vector<1x8x1xf32>
    %27 = vector.shape_cast %26 : vector<1x8x1xf32> to vector<8x1xf32>
    %28 = vector.broadcast %27 : vector<8x1xf32> to vector<8x222xf32>
    %29 = arith.mulf %25, %28 : vector<8x222xf32>
    %30 = arith.addf %24, %29 : vector<8x222xf32>
    %31 = vector.extract_strided_slice %0 {offsets = [0, 17], sizes = [8, 222], strides = [1, 1]} : vector<8x256xf32> to vector<8x222xf32>
    %32 = vector.extract_strided_slice %1 {offsets = [4, 0, 0], sizes = [1, 8, 1], strides = [1, 1, 1]} : vector<9x8x1xf32> to vector<1x8x1xf32>
    %33 = vector.shape_cast %32 : vector<1x8x1xf32> to vector<8x1xf32>
    %34 = vector.broadcast %33 : vector<8x1xf32> to vector<8x222xf32>
    %35 = arith.mulf %31, %34 : vector<8x222xf32>
    %36 = arith.addf %30, %35 : vector<8x222xf32>
    %37 = vector.extract_strided_slice %0 {offsets = [0, 18], sizes = [8, 222], strides = [1, 1]} : vector<8x256xf32> to vector<8x222xf32>
    %38 = vector.extract_strided_slice %1 {offsets = [5, 0, 0], sizes = [1, 8, 1], strides = [1, 1, 1]} : vector<9x8x1xf32> to vector<1x8x1xf32>
    %39 = vector.shape_cast %38 : vector<1x8x1xf32> to vector<8x1xf32>
    %40 = vector.broadcast %39 : vector<8x1xf32> to vector<8x222xf32>
    %41 = arith.mulf %37, %40 : vector<8x222xf32>
    %42 = arith.addf %36, %41 : vector<8x222xf32>
    %43 = vector.extract_strided_slice %0 {offsets = [0, 32], sizes = [8, 222], strides = [1, 1]} : vector<8x256xf32> to vector<8x222xf32>
    %44 = vector.extract_strided_slice %1 {offsets = [6, 0, 0], sizes = [1, 8, 1], strides = [1, 1, 1]} : vector<9x8x1xf32> to vector<1x8x1xf32>
    %45 = vector.shape_cast %44 : vector<1x8x1xf32> to vector<8x1xf32>
    %46 = vector.broadcast %45 : vector<8x1xf32> to vector<8x222xf32>
    %47 = arith.mulf %43, %46 : vector<8x222xf32>
    %48 = arith.addf %42, %47 : vector<8x222xf32>
    %49 = vector.extract_strided_slice %0 {offsets = [0, 33], sizes = [8, 222], strides = [1, 1]} : vector<8x256xf32> to vector<8x222xf32>
    %50 = vector.extract_strided_slice %1 {offsets = [7, 0, 0], sizes = [1, 8, 1], strides = [1, 1, 1]} : vector<9x8x1xf32> to vector<1x8x1xf32>
    %51 = vector.shape_cast %50 : vector<1x8x1xf32> to vector<8x1xf32>
    %52 = vector.broadcast %51 : vector<8x1xf32> to vector<8x222xf32>
    %53 = arith.mulf %49, %52 : vector<8x222xf32>
    %54 = arith.addf %48, %53 : vector<8x222xf32>
    %55 = vector.extract_strided_slice %0 {offsets = [0, 34], sizes = [8, 222], strides = [1, 1]} : vector<8x256xf32> to vector<8x222xf32>
    %56 = vector.extract_strided_slice %1 {offsets = [8, 0, 0], sizes = [1, 8, 1], strides = [1, 1, 1]} : vector<9x8x1xf32> to vector<1x8x1xf32>
    %57 = vector.shape_cast %56 : vector<1x8x1xf32> to vector<8x1xf32>
    %58 = vector.broadcast %57 : vector<8x1xf32> to vector<8x222xf32>
    %59 = arith.mulf %55, %58 : vector<8x222xf32>
    %60 = arith.addf %54, %59 : vector<8x222xf32>
    %cst = arith.constant 0.000000e+00 : f32
    %61 = vector.broadcast %cst : f32 to vector<8x222xf32>
    %62 = arith.maximumf %60, %61 : vector<8x222xf32>
    %63 = vector.shape_cast %4 : vector<8x1xf32> to vector<8x1xf32>
    %64 = vector.broadcast %63 : vector<8x1xf32> to vector<8x222xf32>
    %65 = vector.extract_strided_slice %3 {offsets = [0, 0, 0], sizes = [1, 8, 1], strides = [1, 1, 1]} : vector<4x8x1xf32> to vector<1x8x1xf32>
    %66 = vector.shape_cast %65 : vector<1x8x1xf32> to vector<8x1xf32>
    %67 = vector.extract_strided_slice %62 {offsets = [0, 0], sizes = [1, 222], strides = [1, 1]} : vector<8x222xf32> to vector<1x222xf32>
    %68 = vector.broadcast %66 : vector<8x1xf32> to vector<8x222xf32>
    %69 = vector.broadcast %67 : vector<1x222xf32> to vector<8x222xf32>
    %70 = arith.mulf %68, %69 : vector<8x222xf32>
    %71 = arith.addf %64, %70 : vector<8x222xf32>
    %72 = vector.extract_strided_slice %3 {offsets = [1, 0, 0], sizes = [1, 8, 1], strides = [1, 1, 1]} : vector<4x8x1xf32> to vector<1x8x1xf32>
    %73 = vector.shape_cast %72 : vector<1x8x1xf32> to vector<8x1xf32>
    %74 = vector.extract_strided_slice %62 {offsets = [1, 0], sizes = [1, 222], strides = [1, 1]} : vector<8x222xf32> to vector<1x222xf32>
    %75 = vector.broadcast %73 : vector<8x1xf32> to vector<8x222xf32>
    %76 = vector.broadcast %74 : vector<1x222xf32> to vector<8x222xf32>
    %77 = arith.mulf %75, %76 : vector<8x222xf32>
    %78 = arith.addf %71, %77 : vector<8x222xf32>
    %79 = vector.extract_strided_slice %3 {offsets = [2, 0, 0], sizes = [1, 8, 1], strides = [1, 1, 1]} : vector<4x8x1xf32> to vector<1x8x1xf32>
    %80 = vector.shape_cast %79 : vector<1x8x1xf32> to vector<8x1xf32>
    %81 = vector.extract_strided_slice %62 {offsets = [2, 0], sizes = [1, 222], strides = [1, 1]} : vector<8x222xf32> to vector<1x222xf32>
    %82 = vector.broadcast %80 : vector<8x1xf32> to vector<8x222xf32>
    %83 = vector.broadcast %81 : vector<1x222xf32> to vector<8x222xf32>
    %84 = arith.mulf %82, %83 : vector<8x222xf32>
    %85 = arith.addf %78, %84 : vector<8x222xf32>
    %86 = vector.extract_strided_slice %3 {offsets = [3, 0, 0], sizes = [1, 8, 1], strides = [1, 1, 1]} : vector<4x8x1xf32> to vector<1x8x1xf32>
    %87 = vector.shape_cast %86 : vector<1x8x1xf32> to vector<8x1xf32>
    %88 = vector.extract_strided_slice %62 {offsets = [3, 0], sizes = [1, 222], strides = [1, 1]} : vector<8x222xf32> to vector<1x222xf32>
    %89 = vector.broadcast %87 : vector<8x1xf32> to vector<8x222xf32>
    %90 = vector.broadcast %88 : vector<1x222xf32> to vector<8x222xf32>
    %91 = arith.mulf %89, %90 : vector<8x222xf32>
    %92 = arith.addf %85, %91 : vector<8x222xf32>
    %cst_11 = arith.constant 0.000000e+00 : f32
    %93 = vector.broadcast %cst_11 : f32 to vector<8x222xf32>
    %94 = arith.maximumf %92, %93 : vector<8x222xf32>
    %c0_12 = arith.constant 0 : index
    %c0_13 = arith.constant 0 : index
    %95 = vector.load %arg6[%c0_12, %c0_13] : memref<16x222xf32, #tpu.memory_space<vmem>>, vector<8x222xf32>
    tpu.vector_store %arg6[%c0_12, %c0_13], %94 {strides = array<i32>} : memref<16x222xf32, #tpu.memory_space<vmem>>, vector<8x222xf32>,
    %96 = vector.extract_strided_slice %3 {offsets = [0, 0, 0], sizes = [1, 8, 1], strides = [1, 1, 1]} : vector<4x8x1xf32> to vector<1x8x1xf32>
    %97 = vector.shape_cast %96 : vector<1x8x1xf32> to vector<8x1xf32>
    %98 = vector.extract_strided_slice %62 {offsets = [4, 0], sizes = [1, 222], strides = [1, 1]} : vector<8x222xf32> to vector<1x222xf32>
    %99 = vector.broadcast %97 : vector<8x1xf32> to vector<8x222xf32>
    %100 = vector.broadcast %98 : vector<1x222xf32> to vector<8x222xf32>
    %101 = arith.mulf %99, %100 : vector<8x222xf32>
    %102 = arith.addf %64, %101 : vector<8x222xf32>
    %103 = vector.extract_strided_slice %3 {offsets = [1, 0, 0], sizes = [1, 8, 1], strides = [1, 1, 1]} : vector<4x8x1xf32> to vector<1x8x1xf32>
    %104 = vector.shape_cast %103 : vector<1x8x1xf32> to vector<8x1xf32>
    %105 = vector.extract_strided_slice %62 {offsets = [5, 0], sizes = [1, 222], strides = [1, 1]} : vector<8x222xf32> to vector<1x222xf32>
    %106 = vector.broadcast %104 : vector<8x1xf32> to vector<8x222xf32>
    %107 = vector.broadcast %105 : vector<1x222xf32> to vector<8x222xf32>
    %108 = arith.mulf %106, %107 : vector<8x222xf32>
    %109 = arith.addf %102, %108 : vector<8x222xf32>
    %110 = vector.extract_strided_slice %3 {offsets = [2, 0, 0], sizes = [1, 8, 1], strides = [1, 1, 1]} : vector<4x8x1xf32> to vector<1x8x1xf32>
    %111 = vector.shape_cast %110 : vector<1x8x1xf32> to vector<8x1xf32>
    %112 = vector.extract_strided_slice %62 {offsets = [6, 0], sizes = [1, 222], strides = [1, 1]} : vector<8x222xf32> to vector<1x222xf32>
    %113 = vector.broadcast %111 : vector<8x1xf32> to vector<8x222xf32>
    %114 = vector.broadcast %112 : vector<1x222xf32> to vector<8x222xf32>
    %115 = arith.mulf %113, %114 : vector<8x222xf32>
    %116 = arith.addf %109, %115 : vector<8x222xf32>
    %117 = vector.extract_strided_slice %3 {offsets = [3, 0, 0], sizes = [1, 8, 1], strides = [1, 1, 1]} : vector<4x8x1xf32> to vector<1x8x1xf32>
    %118 = vector.shape_cast %117 : vector<1x8x1xf32> to vector<8x1xf32>
    %119 = vector.extract_strided_slice %62 {offsets = [7, 0], sizes = [1, 222], strides = [1, 1]} : vector<8x222xf32> to vector<1x222xf32>
    %120 = vector.broadcast %118 : vector<8x1xf32> to vector<8x222xf32>
    %121 = vector.broadcast %119 : vector<1x222xf32> to vector<8x222xf32>
    %122 = arith.mulf %120, %121 : vector<8x222xf32>
    %123 = arith.addf %116, %122 : vector<8x222xf32>
    %cst_14 = arith.constant 0.000000e+00 : f32
    %124 = vector.broadcast %cst_14 : f32 to vector<8x222xf32>
    %125 = arith.maximumf %123, %124 : vector<8x222xf32>
    %c8 = arith.constant 8 : index
    %c0_15 = arith.constant 0 : index
    %126 = vector.load %arg6[%c8, %c0_15] : memref<16x222xf32, #tpu.memory_space<vmem>>, vector<8x222xf32>
    tpu.vector_store %arg6[%c8, %c0_15], %125 {strides = array<i32>} : memref<16x222xf32, #tpu.memory_space<vmem>>, vector<8x222xf32>,
    return
  }
  func.func @transform_0(%arg0: i32) -> (i32, i32) {
    %c0_i32 = arith.constant 0 : i32
    %c0_i32_0 = arith.constant 0 : i32
    return %arg0, %c0_i32 : i32, i32
  }
  func.func @transform_1(%arg0: i32) -> (i32, i32, i32) {
    %c0_i32 = arith.constant 0 : i32
    %c0_i32_0 = arith.constant 0 : i32
    %c0_i32_1 = arith.constant 0 : i32
    %c0_i32_2 = arith.constant 0 : i32
    return %c0_i32, %c0_i32_0, %c0_i32_1 : i32, i32, i32
  }
  func.func @transform_2(%arg0: i32) -> (i32, i32) {
    %c0_i32 = arith.constant 0 : i32
    %c0_i32_0 = arith.constant 0 : i32
    %c0_i32_1 = arith.constant 0 : i32
    return %c0_i32, %c0_i32_0 : i32, i32
  }
  func.func @transform_3(%arg0: i32) -> (i32, i32, i32) {
    %c0_i32 = arith.constant 0 : i32
    %c0_i32_0 = arith.constant 0 : i32
    %c0_i32_1 = arith.constant 0 : i32
    %c0_i32_2 = arith.constant 0 : i32
    return %c0_i32, %c0_i32_0, %c0_i32_1 : i32, i32, i32
  }
  func.func @transform_4(%arg0: i32) -> (i32, i32) {
    %c0_i32 = arith.constant 0 : i32
    %c0_i32_0 = arith.constant 0 : i32
    %c0_i32_1 = arith.constant 0 : i32
    return %c0_i32, %c0_i32_0 : i32, i32
  }
  func.func @transform_5(%arg0: i32) -> (i32, i32) {
    %c0_i32 = arith.constant 0 : i32
    %c0_i32_0 = arith.constant 0 : i32
    return %arg0, %c0_i32 : i32, i32
  }
}

</mosaic_0001>

<bundles_post_ra>
// kernel: tile.18
= control target key start
LH: loop header
LB: loop body
LE: loop exit
PB: predicated region body
PF: predicated region fallthrough
CT: control target
= control target key end

     0   :  { %s22_s0 = inlined_call_operand.vmem [shape: f32[4], index: 0, kind: input, shape index: {}]   ;;  %s23_s1 = inlined_call_operand.vmem [shape: f32[2,4], index: 1, kind: output, shape index: {}]  }
   0x1   :  { %v4_v0 = vld [vmem:[%s22_s0] ss:$0 sm:$0xff] }
   0x2   :  { %5 = vst [vmem:[%s23_s1] sm:$0x3] %v4_v0 }

// kernel: tile.0
= control target key start
LH: loop header
LB: loop body
LE: loop exit
PB: predicated region body
PF: predicated region fallthrough
CT: control target
= control target key end

     0   :  { %s34_s8 = smov 125   ;;  %vm7_vm0 = vcmask 7168   ;;  %s35_s11 = smov 126   ;;  %s61_s0 = inlined_call_operand.vmem [shape: f32[2,4], index: 0, kind: input, shape index: {}]   ;;  %s62_s1 = inlined_call_operand.vmem [shape: f32[8,1], index: 1, kind: output, shape index: {}]  }
   0x1   :  { %v4_v0 = vld [vmem:[%s61_s0] sm:$0x3]  ;;  %s33_s0 = smov 127  }
   0x2   :  { %5 = vst [vmem:[#allocation0] sm:$0x3] %v4_v0 }
   0x9   :  { %v9_v1 = vld [vmem:[#allocation0] sm:$0x3]  }
   0xa   :  { %v21_v2 = vld [vmem:[#allocation0] sm:$0x3]   ;;  %10 = vrot.lane.b32.xlu0 %v9_v1, %s33_s0 }
   0xb   :  { %22 = vrot.lane.b32.xlu1 %v21_v2, %s34_s8  ;;  %v6_v3 = vld [vmem:[#allocation0] sm:$0x3]  }
   0xc   :  { %v15_v4 = vld [vmem:[#allocation0] sm:$0x3]   ;;  %8 = vst.msk [vmem:[%s62_s1] ss:$4 sm:$0x3] %vm7_vm0, %v6_v3  }
   0xe   :  { %16 = vrot.lane.b32.xlu0 %v15_v4, %s35_s11 }
  0x7c   :  { %v11_v5 = vpop.permute.xlu0 %10  }
  0x7d   :  { %v23_v6 = vpop.permute.xlu1 %22   ;;  %27 = vst.msk [vmem:[%s62_s1 + $0x1] ss:$4 sm:$0x3] %vm7_vm0, %v11_v5  }
  0x7e   :  { %29 = vst.msk [vmem:[%s62_s1 + $0x3] ss:$4 sm:$0x3] %vm7_vm0, %v23_v6  }
  0x80   :  { %v17_v7 = vpop.permute.xlu0 %16  }
  0x81   :  { %28 = vst.msk [vmem:[%s62_s1 + $0x2] ss:$4 sm:$0x3] %vm7_vm0, %v17_v7  }

// kernel: dws_conv.1
= control target key start
LH: loop header
LB: loop body
LE: loop exit
PB: predicated region body
PF: predicated region fallthrough
CT: control target
= control target key end

     0   :  { %v349_v0 = vmov 0   ;;  %s353_s20 = smov 111   ;;  %s354_s21 = smov 110   ;;  %vm64_vm0 = vcmask 1039360   ;;  %vm83_vm1 = vcmask 1031168   ;;  %vm102_vm2 = vcmask 916480   ;;  %s488_s1 = inlined_call_operand.vmem [shape: f32[9,8,1], index: 1, kind: input, shape index: {}]   ;;  %s489_s2 = inlined_call_operand.vmem [shape: f32[8,1], index: 2, kind: input, shape index: {}]   ;;  %s490_s4 = inlined_call_operand.vmem [shape: f32[8,1], index: 4, kind: input, shape index: {}]   ;;  %s491_s3 = inlined_call_operand.vmem [shape: f32[4,8,1], index: 3, kind: input, shape index: {}]   ;;  %s492_s0 = inlined_call_operand.vmem [shape: f32[8,256], index: 0, kind: input, shape index: {}]   ;;  %s493_s5 = inlined_call_operand.vmem [shape: f32[16,222], index: 5, kind: output, shape index: {}]  }
   0x1   :  { %348 = vset.pattern.permute.xlu1 %v349_v0  ;;  %347 = vset.pattern.permute.xlu0 %v349_v0  ;;  %v25_v1 = vld [vmem:[%s488_s1 + $0x18] sm:$0xff]  ;;  %v23_v2 = vld [vmem:[%s488_s1 + $0x8] sm:$0xff]  ;;  %v26_v3 = vld [vmem:[%s488_s1 + $0x20] sm:$0xff]  ;;  %s355_s22 = smov 96   ;;  %s356_s23 = smov 95   ;;  %vm121_vm3 = vcmask 908288  }
   0x2   :  { %91 = vperm.xlu1 %348, %v25_v1   ;;  %53 = vperm.xlu0 %347, %v23_v2   ;;  %v24_v4 = vld [vmem:[%s488_s1 + $0x10] sm:$0xff]  ;;  %v27_v6 = vld [vmem:[%s488_s1 + $0x28] sm:$0xff]  ;;  %v30_v7 = vld [vmem:[%s488_s1 + $0x40] sm:$0xff]  ;;  %s357_s24 = smov 94   ;;  %vm140_vm4 = vcmask 900096   ;;  %vm159_vm5 = vcmask 785408  }
   0x3   :  { %v28_v5 = vld [vmem:[%s488_s1 + $0x30] sm:$0xff]  ;;  %v29_v8 = vld [vmem:[%s488_s1 + $0x38] sm:$0xff]  ;;  %v31_v9 = vld [vmem:[%s489_s2] sm:$0xff]  ;;  %vm178_vm6 = vcmask 777216   ;;  %vm197_vm7 = vcmask 769024  }
   0x4   :  { %v22_v10 = vld [vmem:[%s488_s1] sm:$0xff]  ;;  %v432_v14 = vld [vmem:[%s492_s0 + $0x8] sm:$0xff]  ;;  %s350_s1 = smov 127   ;;  %v34_v39 = vld [vmem:[%s491_s3 + $0x10] sm:$0xff] }
   0x5   :  { %v36_v11 = vld [vmem:[%s490_s4] sm:$0xff]  ;;  %s352_s4 = smov 112   ;;  %v33_v40 = vld [vmem:[%s491_s3 + $0x8] sm:$0xff]  ;;  %v35_v41 = vld [vmem:[%s491_s3 + $0x18] sm:$0xff] }
   0x6   :  { %110 = vperm.xlu1 %348, %v26_v3   ;;  %72 = vperm.xlu0 %347, %v24_v4   ;;  %v32_v12 = vld [vmem:[%s491_s3] sm:$0xff] }
   0x7   :  { %v427_v13 = vld [vmem:[%s492_s0] sm:$0xff]  ;;  %s351_s0 = smov 126  }
   0xa   :  { %148 = vperm.xlu1 %348, %v28_v5   ;;  %129 = vperm.xlu0 %347, %v27_v6  }
   0xe   :  { %186 = vperm.xlu1 %348, %v30_v7   ;;  %167 = vperm.xlu0 %347, %v29_v8  }
  0x12   :  { %39 = vperm.xlu1 %348, %v31_v9   ;;  %44 = vperm.xlu0 %347, %v22_v10  }
  0x16   :  { %207 = vperm.xlu1 %348, %v36_v11   ;;  %212 = vperm.xlu0 %347, %v32_v12  }
  0x81   :  { %v54_v15 = vpop.permute.xlu0 %53  ;;  %v92_v21 = vpop.permute.xlu1 %91 }
  0x82   :  { %v56_v16 = vmul.f32 %v54_v15, %v427_v13  ;;  %v57_v17 = vmul.f32 %v54_v15, %v432_v14  ;;  %v94_v22 = vmul.f32 %v92_v21, %v427_v13  ;;  %v95_v23 = vmul.f32 %v92_v21, %v432_v14 }
  0x84   :  { %62 = vrot.lane.b32.xlu1 %v57_v17, %s350_s1  ;;  %60 = vrot.lane.b32.xlu0 %v56_v16, %s350_s1 }
  0x85   :  { %v73_v18 = vpop.permute.xlu0 %72  ;;  %v111_v24 = vpop.permute.xlu1 %110 }
  0x86   :  { %v75_v19 = vmul.f32 %v73_v18, %v427_v13  ;;  %v76_v20 = vmul.f32 %v73_v18, %v432_v14  ;;  %v113_v25 = vmul.f32 %v111_v24, %v427_v13  ;;  %v114_v26 = vmul.f32 %v111_v24, %v432_v14 }
  0x87   :  { %v215_v18 = vlaneseq }
  0x88   :  { %81 = vrot.lane.b32.xlu1 %v76_v20, %s351_s0  ;;  %79 = vrot.lane.b32.xlu0 %v75_v19, %s351_s0 }
  0x89   :  { %v130_v27 = vpop.permute.xlu0 %129  ;;  %v149_v30 = vpop.permute.xlu1 %148 }
  0x8a   :  { %v132_v28 = vmul.f32 %v130_v27, %v427_v13  ;;  %v133_v29 = vmul.f32 %v130_v27, %v432_v14  ;;  %v151_v31 = vmul.f32 %v149_v30, %v427_v13  ;;  %v152_v32 = vmul.f32 %v149_v30, %v432_v14 }
  0x8c   :  { %100 = vrot.lane.b32.xlu1 %v95_v23, %s352_s4  ;;  %98 = vrot.lane.b32.xlu0 %v94_v22, %s352_s4 }
  0x8d   :  { %v168_v33 = vpop.permute.xlu0 %167  ;;  %v187_v36 = vpop.permute.xlu1 %186 }
  0x8e   :  { %v170_v34 = vmul.f32 %v168_v33, %v427_v13  ;;  %v171_v35 = vmul.f32 %v168_v33, %v432_v14  ;;  %v189_v37 = vmul.f32 %v187_v36, %v427_v13  ;;  %v190_v38 = vmul.f32 %v187_v36, %v432_v14 }
  0x90   :  { %119 = vrot.lane.b32.xlu1 %v114_v26, %s353_s20  ;;  %117 = vrot.lane.b32.xlu0 %v113_v25, %s353_s20  ;;  %v216_v26 = vshrl.u32 %v215_v18, 7 }
  0x91   :  { %v40_v42 = vpop.permute.xlu1 %39  ;;  %v45_v43 = vpop.permute.xlu0 %44 }
  0x92   :  { %v48_v52 = vmul.f32 %v45_v43, %v432_v14  ;;  %v47_v53 = vmul.f32 %v45_v43, %v427_v13  ;;  %v251_v36 = vsub.s32 2, %v216_v26 }
  0x94   :  { %138 = vrot.lane.b32.xlu1 %v133_v29, %s354_s21  ;;  %136 = vrot.lane.b32.xlu0 %v132_v28, %s354_s21  ;;  %v50_v56 = vadd.f32 %v48_v52, %v40_v42  ;;  %v49_v58 = vadd.f32 %v47_v53, %v40_v42  ;;  %v217_v29 = vsub.s32 0, %v216_v26  ;;  %v320_v42 = vsub.s32 7, %v216_v26 }
  0x95   :  { %v459_v44 = vpop.permute.xlu1 %207  ;;  %v461_v45 = vpop.permute.xlu0 %212 }
  0x98   :  { %157 = vrot.lane.b32.xlu1 %v152_v32, %s355_s22  ;;  %155 = vrot.lane.b32.xlu0 %v151_v31, %s355_s22  ;;  %v284_v31 = vsub.s32 4, %v216_v26 }
  0x9c   :  { %176 = vrot.lane.b32.xlu1 %v171_v35, %s356_s23  ;;  %174 = vrot.lane.b32.xlu0 %v170_v34, %s356_s23 }
  0xa0   :  { %195 = vrot.lane.b32.xlu1 %v190_v38, %s357_s24  ;;  %193 = vrot.lane.b32.xlu0 %v189_v37, %s357_s24  ;;  %v308_v37 = vsub.s32 6, %v216_v26  ;;  %v234_v38 = vsub.s32 1, %v216_v26 }
  0xa4   :  { %246 = vperm.xlu1 %348, %v34_v39   ;;  %229 = vperm.xlu0 %347, %v33_v40   ;;  %v296_v39 = vsub.s32 5, %v216_v26 }
  0xa8   :  { %263 = vperm.xlu0 %347, %v35_v41   ;;  %v268_v41 = vsub.s32 3, %v216_v26 }
  0xf6   :  { %v63_v46 = vpop.permute.xlu1 %62  ;;  %v61_v47 = vpop.permute.xlu0 %60 }
  0xf7   :  { %v65_v57 = vsel %vm64_vm0, %v61_v47, %v63_v46  ;;  %v69_v59 = vadd.f32 %v63_v46, %v50_v56 }
  0xf8   :  { %v68_v61 = vadd.f32 %v65_v57, %v49_v58 }
  0xfa   :  { %v82_v48 = vpop.permute.xlu1 %81  ;;  %v80_v49 = vpop.permute.xlu0 %79 }
  0xfb   :  { %v84_v60 = vsel %vm83_vm1, %v80_v49, %v82_v48  ;;  %v88_v0 = vadd.f32 %v82_v48, %v69_v59 }
  0xfc   :  { %v87_v2 = vadd.f32 %v84_v60, %v68_v61 }
  0xfe   :  { %v101_v50 = vpop.permute.xlu1 %100  ;;  %v99_v51 = vpop.permute.xlu0 %98 }
  0xff   :  { %v103_v1 = vsel %vm102_vm2, %v99_v51, %v101_v50  ;;  %v107_v3 = vadd.f32 %v101_v50, %v88_v0 }
 0x100   :  { %v106_v5 = vadd.f32 %v103_v1, %v87_v2 }
 0x102   :  { %v120_v54 = vpop.permute.xlu1 %119  ;;  %v118_v55 = vpop.permute.xlu0 %117 }
 0x103   :  { %v122_v4 = vsel %vm121_vm3, %v118_v55, %v120_v54  ;;  %v126_v8 = vadd.f32 %v120_v54, %v107_v3 }
 0x104   :  { %v125_v10 = vadd.f32 %v122_v4, %v106_v5 }
 0x106   :  { %v139_v62 = vpop.permute.xlu1 %138  ;;  %v137_v63 = vpop.permute.xlu0 %136 }
 0x107   :  { %v141_v9 = vsel %vm140_vm4, %v137_v63, %v139_v62  ;;  %v145_v11 = vadd.f32 %v139_v62, %v126_v8 }
 0x108   :  { %v144_v13 = vadd.f32 %v141_v9, %v125_v10 }
 0x10a   :  { %v158_v6 = vpop.permute.xlu1 %157  ;;  %v156_v7 = vpop.permute.xlu0 %155 }
 0x10b   :  { %v160_v12 = vsel %vm159_vm5, %v156_v7, %v158_v6  ;;  %v164_v16 = vadd.f32 %v158_v6, %v145_v11 }
 0x10c   :  { %v163_v19 = vadd.f32 %v160_v12, %v144_v13 }
 0x10e   :  { %v177_v14 = vpop.permute.xlu1 %176  ;;  %v175_v15 = vpop.permute.xlu0 %174 }
 0x10f   :  { %v179_v17 = vsel %vm178_vm6, %v175_v15, %v177_v14  ;;  %v183_v20 = vadd.f32 %v177_v14, %v164_v16 }
 0x110   :  { %v182_v21 = vadd.f32 %v179_v17, %v163_v19 }
 0x112   :  { %v196_v22 = vpop.permute.xlu1 %195  ;;  %v194_v23 = vpop.permute.xlu0 %193 }
 0x113   :  { %v202_v24 = vadd.f32 %v196_v22, %v183_v20  ;;  %v198_v25 = vsel %vm197_vm7, %v194_v23, %v196_v22 }
 0x114   :  { %v201_v27 = vadd.f32 %v198_v25, %v182_v21 }
 0x115   :  { %v204_v28 = vmax.f32 %v202_v24, 0.0 }
 0x116   :  { %v203_v30 = vmax.f32 %v201_v27, 0.0 }
 0x117   :  { %v222_v32 = vrot.slane %v204_v28, %v217_v29  ;;  %v289_v33 = vrot.slane %v204_v28, %v284_v31  ;;  %v256_v49 = vrot.slane %v204_v28, %v251_v36  ;;  %v313_v50 = vrot.slane %v204_v28, %v308_v37 }
 0x118   :  { %v218_v34 = vrot.slane %v203_v30, %v217_v29  ;;  %v285_v35 = vrot.slane %v203_v30, %v284_v31  ;;  %v252_v48 = vrot.slane %v203_v30, %v251_v36  ;;  %v239_v51 = vrot.slane %v204_v28, %v234_v38 }
 0x119   :  { %v224_v40 = vmul.f32 %v222_v32, %v461_v45  ;;  %v291_v43 = vmul.f32 %v289_v33, %v461_v45  ;;  %v309_v52 = vrot.slane %v203_v30, %v308_v37  ;;  %v301_v53 = vrot.slane %v204_v28, %v296_v39 }
 0x11a   :  { %v223_v46 = vmul.f32 %v218_v34, %v461_v45  ;;  %v290_v47 = vmul.f32 %v285_v35, %v461_v45  ;;  %v235_v54 = vrot.slane %v203_v30, %v234_v38  ;;  %v297_v55 = vrot.slane %v203_v30, %v296_v39 }
 0x11b   :  { %v226_v57 = vadd.f32 %v224_v40, %v459_v44  ;;  %v273_v59 = vrot.slane %v204_v28, %v268_v41  ;;  %v325_v60 = vrot.slane %v204_v28, %v320_v42  ;;  %v269_v61 = vrot.slane %v203_v30, %v268_v41 }
 0x11c   :  { %v293_v62 = vadd.f32 %v291_v43, %v459_v44  ;;  %v225_v63 = vadd.f32 %v223_v46, %v459_v44  ;;  %v292_v45 = vadd.f32 %v290_v47, %v459_v44  ;;  %v321_v0 = vrot.slane %v203_v30, %v320_v42 }
 0x123   :  { %v247_v56 = vpop.permute.xlu1 %246  ;;  %v230_v58 = vpop.permute.xlu0 %229 }
 0x124   :  { %v240_v1 = vmul.f32 %v235_v54, %v230_v58  ;;  %v241_v2 = vmul.f32 %v239_v51, %v230_v58  ;;  %v302_v3 = vmul.f32 %v297_v55, %v230_v58  ;;  %v303_v4 = vmul.f32 %v301_v53, %v230_v58 }
 0x125   :  { %v257_v5 = vmul.f32 %v252_v48, %v247_v56  ;;  %v258_v6 = vmul.f32 %v256_v49, %v247_v56  ;;  %v314_v7 = vmul.f32 %v309_v52, %v247_v56  ;;  %v315_v8 = vmul.f32 %v313_v50, %v247_v56 }
 0x126   :  { %v242_v9 = vadd.f32 %v240_v1, %v225_v63  ;;  %v243_v10 = vadd.f32 %v241_v2, %v226_v57  ;;  %v304_v11 = vadd.f32 %v302_v3, %v292_v45  ;;  %v305_v12 = vadd.f32 %v303_v4, %v293_v62 }
 0x127   :  { %v264_v13 = vpop.permute.xlu0 %263 }
 0x128   :  { %v274_v14 = vmul.f32 %v269_v61, %v264_v13  ;;  %v275_v15 = vmul.f32 %v273_v59, %v264_v13  ;;  %v326_v16 = vmul.f32 %v321_v0, %v264_v13  ;;  %v327_v17 = vmul.f32 %v325_v60, %v264_v13 }
 0x129   :  { %v260_v18 = vadd.f32 %v258_v6, %v243_v10  ;;  %v317_v44 = vadd.f32 %v315_v8, %v305_v12  ;;  %v259_v19 = vadd.f32 %v257_v5, %v242_v9  ;;  %v316_v20 = vadd.f32 %v314_v7, %v304_v11 }
 0x12b   :  { %v276_v21 = vadd.f32 %v274_v14, %v259_v19  ;;  %v277_v22 = vadd.f32 %v275_v15, %v260_v18  ;;  %v328_v23 = vadd.f32 %v326_v16, %v316_v20  ;;  %v329_v24 = vadd.f32 %v327_v17, %v317_v44 }
 0x12d   :  { %v278_v25 = vmax.f32 %v276_v21, 0.0  ;;  %v279_v26 = vmax.f32 %v277_v22, 0.0  ;;  %v330_v27 = vmax.f32 %v328_v23, 0.0  ;;  %v331_v28 = vmax.f32 %v329_v24, 0.0 }
 0x12f   :  { %280 = vst [vmem:[%s493_s5] sm:$0xff] %v278_v25  ;;  %281 = vst.msk [vmem:[%s493_s5 + $0x8] sm:$0xff] %vm197_vm7, %v279_v26 }
 0x130   :  { %332 = vst [vmem:[%s493_s5 + $0x10] sm:$0xff] %v330_v27  ;;  %333 = vst.msk [vmem:[%s493_s5 + $0x18] sm:$0xff] %vm197_vm7, %v331_v28 }

</bundles_post_ra>
